<compile_context>
chip_gen: v6e
topology: v6e:2x2x1
jax: 0.10.0
libtpu: 0.0.40
codegen_flags: <defaults>
</compile_context>

<pallas_src>
import functools

import jax
import jax.numpy as jnp
from jax import lax
from jax.experimental import pallas as pl
from jax.experimental.pallas import tpu as pltpu

LANES = 128              # lane dimension of the slab (vreg lane width)
ACC_ROWS = 8             # sublane height of the vreg-shaped accumulator
MAX_TILE_ROWS = 8192     # 8192 * 128 * 4 B = 4 MiB per operand tile
VMEM_LIMIT_BYTES = 32 * 1024 * 1024  # 16 MiB pipeline buffers + headroom


def _num_tensorcores():
    """Best-effort trace-time TensorCore count (1 on v5e/v6e, 2 on v7x)."""
    try:
        info = pltpu.get_tpu_info()
    except Exception:
        return 1
    for attr in ("num_tensorcores", "tensorcore_count", "num_cores",
                 "core_count", "num_tensor_cores"):
        v = getattr(info, attr, None)
        if isinstance(v, int) and 1 <= v <= 8:
            return v
    return 1


def _l1_partial_kernel(o_ref, t_ref, acc_ref, *, rows, tile_rows, inner_tiles,
                       tiles_total, needs_mask):
    # o_ref / t_ref : VMEM tiles (tile_rows, LANES) of the operands
    # acc_ref       : (1, ACC_ROWS, LANES) f32 output block; resident across
    #                 the inner (reduction) grid axis -> used as accumulator
    c = pl.program_id(0)
    i = pl.program_id(1)

    @pl.when(i == 0)
    def _():
        acc_ref[...] = jnp.zeros_like(acc_ref)

    absd = jnp.abs(t_ref[...].astype(jnp.float32) - o_ref[...].astype(jnp.float32))

    def accumulate(vals):
        # Fold the (tile_rows, 128) tile into 8x128 lane-wise partial sums
        # (pure VPU adds; the single cross-lane reduce happens in JAX glue).
        folded = vals.reshape(-1, ACC_ROWS, LANES).sum(axis=0)
        acc_ref[...] += folded[jnp.newaxis]

    if needs_mask:
        # Only the last real tile and clamped "phantom" tiles of the core
        # split need masking; interior tiles take the unmasked fast path.
        logical_tile = c * inner_tiles + i
        is_edge = logical_tile >= tiles_total - 1

        @pl.when(is_edge)
        def _():
            row_start = logical_tile * tile_rows
            local_row = lax.broadcasted_iota(jnp.int32, absd.shape, 0)
            accumulate(jnp.where(row_start + local_row < rows, absd, 0.0))

        @pl.when(jnp.logical_not(is_edge))
        def _():
            accumulate(absd)
    else:
        accumulate(absd)


def l1_loss(output, target):
    assert output.shape == target.shape, "shapes must match (no broadcasting needed)"
    n_elem = output.size

    o_flat = output.reshape(-1)
    t_flat = target.reshape(-1)

    itemsize = jnp.dtype(o_flat.dtype).itemsize
    # Sublane granule: 8 rows for 4-byte dtypes, 16 for 2-byte, 32 for 1-byte
    # (keeps the BlockSpec legal for sub-32-bit inputs as well).
    row_mult = max(ACC_ROWS, 32 // max(itemsize, 1))
    granule = row_mult * LANES

    main_elems = (n_elem // granule) * granule
    tail_elems = n_elem - main_elems

    # Tail (< granule elements, usually 0): summed in glue -- no pad copy.
    if tail_elems:
        o_tail = o_flat[main_elems:].astype(jnp.float32)
        t_tail = t_flat[main_elems:].astype(jnp.float32)
        tail_sum = jnp.sum(jnp.abs(t_tail - o_tail))
    else:
        tail_sum = jnp.float32(0.0)

    if main_elems == 0:
        total = tail_sum
    else:
        rows = main_elems // LANES           # multiple of row_mult (>= 8)
        o2d = o_flat[:main_elems].reshape(rows, LANES)
        t2d = t_flat[:main_elems].reshape(rows, LANES)

        tile_rows = min(MAX_TILE_ROWS, rows)  # multiple of row_mult, <= rows
        tiles_total = pl.cdiv(rows, tile_rows)

        # Core split only when there is more than one TensorCore AND more than
        # one tile; avoids redundant phantom-tile DMA on v5e/v6e.
        num_splits = min(_num_tensorcores(), tiles_total)
        inner_tiles = pl.cdiv(tiles_total, num_splits)
        # Masking is needed iff the tiles do not split perfectly evenly.
        needs_mask = (num_splits * inner_tiles * tile_rows) != rows

        def in_map(c, i):
            # Clamp phantom tiles (past the end) onto the last real tile;
            # their contribution is zeroed by the in-kernel edge mask.
            return (jnp.minimum(c * inner_tiles + i, tiles_total - 1), 0)

        kernel = functools.partial(
            _l1_partial_kernel,
            rows=rows,
            tile_rows=tile_rows,
            inner_tiles=inner_tiles,
            tiles_total=tiles_total,
            needs_mask=needs_mask,
        )

        if num_splits > 1:
            # Multi-TC chips (v7x): shard the leading axis across TensorCores.
            dim_sems = (pltpu.CORE_PARALLEL, pltpu.ARBITRARY)
        else:
            # Single TC: the leading axis has size 1, plain serial loop.
            dim_sems = ("arbitrary", "arbitrary")

        partials = pl.pallas_call(
            kernel,
            out_shape=jax.ShapeDtypeStruct(
                (num_splits, ACC_ROWS, LANES), jnp.float32),
            grid_spec=pltpu.PrefetchScalarGridSpec(
                num_scalar_prefetch=0,
                grid=(num_splits, inner_tiles),
                in_specs=[
                    pl.BlockSpec((tile_rows, LANES), in_map),
                    pl.BlockSpec((tile_rows, LANES), in_map),
                ],
                out_specs=pl.BlockSpec((1, ACC_ROWS, LANES), lambda c, i: (c, 0, 0)),
            ),
            compiler_params=pltpu.CompilerParams(
                dimension_semantics=dim_sems,
                vmem_limit_bytes=VMEM_LIMIT_BYTES,
            ),
            cost_estimate=pl.CostEstimate(
                flops=3 * main_elems,
                transcendentals=0,
                bytes_accessed=2 * main_elems * itemsize
                + num_splits * ACC_ROWS * LANES * 4,
            ),
        )(o2d, t2d)

        # Tiny final reduction (num_splits*8*128 floats) + tail in JAX glue.
        total = jnp.sum(partials) + tail_sum

    return (total / jnp.float32(n_elem)).astype(jnp.float32)


if __name__ == "__main__":
    key = jax.random.PRNGKey(0)
    k_out, k_tgt = jax.random.split(key)

    # Small NCHW-like tensors (batch=2, channels=4, spatial=16x16)
    output = jax.random.normal(k_out, (2, 4, 16, 16), dtype=jnp.float32)
    target = jax.random.normal(k_tgt, (2, 4, 16, 16), dtype=jnp.float32)

    loss = l1_loss(output, target)
    jax.block_until_ready(loss)

    ref = jnp.mean(jnp.abs(target - output))
    assert jnp.allclose(loss, ref, rtol=1e-5, atol=1e-6), (loss, ref)

    # Extra check: element count not a multiple of 1024 (tail handled in glue,
    # no pad copy).
    k2o, k2t = jax.random.split(jax.random.PRNGKey(1))
    out2 = jax.random.normal(k2o, (2, 3, 16, 16), dtype=jnp.float32)
    tgt2 = jax.random.normal(k2t, (2, 3, 16, 16), dtype=jnp.float32)
    loss2 = l1_loss(out2, tgt2)
    jax.block_until_ready(loss2)
    ref2 = jnp.mean(jnp.abs(tgt2 - out2))
    assert jnp.allclose(loss2, ref2, rtol=1e-5, atol=1e-6), (loss2, ref2)

    print("KERNEL_OK")
</pallas_src>

<mosaic_0001>
module attributes {stable_mosaic.version = 11 : i64} {
  func.func @_l1_partial_kernel(%arg0: i32, %arg1: i32, %arg2: memref<16x128xf32, #tpu.memory_space<vmem>>, %arg3: memref<16x128xf32, #tpu.memory_space<vmem>>, %arg4: memref<1x8x128xf32, #tpu.memory_space<vmem>>) attributes {dimension_semantics = [#tpu.dimension_semantics<arbitrary>, #tpu.dimension_semantics<arbitrary>], iteration_bounds = array<i64: 1, 1>, scalar_prefetch = 0 : i64, scratch_operands = 0 : i64, tpu.core_type = #tpu.core_type<tc>, window_params = [{transform_indices = @transform_0, window_bounds = array<i64: 16, 128>}, {transform_indices = @transform_1, window_bounds = array<i64: 16, 128>}, {transform_indices = @transform_2, window_bounds = array<i64: 1, 8, 128>}]} {
    %c0_i32 = arith.constant 0 : i32
    %0 = arith.cmpi eq, %arg1, %c0_i32 : i32
    %1 = arith.extui %0 : i1 to i32
    %c0_i32_0 = arith.constant 0 : i32
    %2 = arith.cmpi ne, %1, %c0_i32_0 : i32
    scf.if %2 {
      %cst_10 = arith.constant 0.000000e+00 : f32
      %13 = vector.broadcast %cst_10 : f32 to vector<1x8x128xf32>
      %c0_11 = arith.constant 0 : index
      %c0_12 = arith.constant 0 : index
      %c0_13 = arith.constant 0 : index
      %14 = vector.load %arg4[%c0_11, %c0_12, %c0_13] : memref<1x8x128xf32, #tpu.memory_space<vmem>>, vector<1x8x128xf32>
      tpu.vector_store %arg4[%c0_11, %c0_12, %c0_13], %13 {strides = array<i32>} : memref<1x8x128xf32, #tpu.memory_space<vmem>>, vector<1x8x128xf32>,
    } else {
    }
    %c0 = arith.constant 0 : index
    %c0_1 = arith.constant 0 : index
    %3 = vector.load %arg3[%c0, %c0_1] : memref<16x128xf32, #tpu.memory_space<vmem>>, vector<16x128xf32>
    %c0_2 = arith.constant 0 : index
    %c0_3 = arith.constant 0 : index
    %4 = vector.load %arg2[%c0_2, %c0_3] : memref<16x128xf32, #tpu.memory_space<vmem>>, vector<16x128xf32>
    %5 = arith.subf %3, %4 : vector<16x128xf32>
    %6 = math.absf %5 : vector<16x128xf32>
    %7 = vector.shape_cast %6 : vector<16x128xf32> to vector<2x8x128xf32>
    %cst = arith.constant dense<0.000000e+00> : vector<8x128xf32>
    %8 = vector.multi_reduction <add>, %7, %cst [0] : vector<2x8x128xf32> to vector<8x128xf32>
    %c0_4 = arith.constant 0 : index
    %c0_5 = arith.constant 0 : index
    %c0_6 = arith.constant 0 : index
    %9 = vector.load %arg4[%c0_4, %c0_5, %c0_6] : memref<1x8x128xf32, #tpu.memory_space<vmem>>, vector<1x8x128xf32>
    %10 = vector.shape_cast %8 : vector<8x128xf32> to vector<1x8x128xf32>
    %11 = arith.addf %9, %10 : vector<1x8x128xf32>
    %c0_7 = arith.constant 0 : index
    %c0_8 = arith.constant 0 : index
    %c0_9 = arith.constant 0 : index
    %12 = vector.load %arg4[%c0_7, %c0_8, %c0_9] : memref<1x8x128xf32, #tpu.memory_space<vmem>>, vector<1x8x128xf32>
    tpu.vector_store %arg4[%c0_7, %c0_8, %c0_9], %11 {strides = array<i32>} : memref<1x8x128xf32, #tpu.memory_space<vmem>>, vector<1x8x128xf32>,
    return
  }
  func.func @transform_0(%arg0: i32, %arg1: i32) -> (i32, i32) {
    %c1_i32 = arith.constant 1 : i32
    %0 = arith.muli %arg0, %c1_i32 : i32
    %1 = arith.addi %0, %arg1 : i32
    %c0_i32 = arith.constant 0 : i32
    %2 = arith.minsi %1, %c0_i32 : i32
    %c0_i32_0 = arith.constant 0 : i32
    %c0_i32_1 = arith.constant 0 : i32
    return %2, %c0_i32_0 : i32, i32
  }
  func.func @transform_1(%arg0: i32, %arg1: i32) -> (i32, i32) {
    %c1_i32 = arith.constant 1 : i32
    %0 = arith.muli %arg0, %c1_i32 : i32
    %1 = arith.addi %0, %arg1 : i32
    %c0_i32 = arith.constant 0 : i32
    %2 = arith.minsi %1, %c0_i32 : i32
    %c0_i32_0 = arith.constant 0 : i32
    %c0_i32_1 = arith.constant 0 : i32
    return %2, %c0_i32_0 : i32, i32
  }
  func.func @transform_2(%arg0: i32, %arg1: i32) -> (i32, i32, i32) {
    %c0_i32 = arith.constant 0 : i32
    %c0_i32_0 = arith.constant 0 : i32
    %c0_i32_1 = arith.constant 0 : i32
    return %arg0, %c0_i32, %c0_i32_0 : i32, i32, i32
  }
}

</mosaic_0001>

<bundles_post_ra>
// kernel: tpu_custom_call.1
= control target key start
LH: loop header
LB: loop body
LE: loop exit
PB: predicated region body
PF: predicated region fallthrough
CT: control target
= control target key end

     0   :  { %7 = vsyncpa [#allocation3], 0  ;;  %s198_s0 = inlined_call_operand.hbm [shape: f32[16,128], index: 0, kind: input, shape index: {}]   ;;  %s199_s1 = inlined_call_operand.hbm [shape: f32[16,128], index: 1, kind: input, shape index: {}]   ;;  %s200_s2 = inlined_call_operand.hbm [shape: f32[1,8,128], index: 2, kind: output, shape index: {}]  }
   0x1   :  { %8 = vsyncpa [#allocation6], 0 }
   0x2   :  { %9 = vsyncpa [#allocation4], 0  ;;  %s169_s9 = smov [#allocation2]  }
   0x3   :  { %s21_s10 = sshll.u32 %s169_s9, 4  ;;  %s22_s10 = int_to_ptr.vmem [resolvable:$true] %s21_s10 }
   0x4   :  { %s111_s11 = scalar_lea.vmem %s22_s10, 256  ;;  %p116_p1 = scmp.lt.s32.totalorder %s22_s10, %s22_s10 }
   0x5   :  { %p112_p0 = scmp.ne.s32.totalorder %s22_s10, %s111_s11  ;;  %p117_p2 = scmp.lt.s32.totalorder %s111_s11, %s111_s11 }
   0x7   :  { %p118_p3 = por %p117_p2, %p116_p1 }
   0x9   :  { %p119_p4 = pnand %p118_p3, %p112_p0 }
   0xb   :  { %122 = shalt.err (!%p119_p4)
}
   0xc   :  { %s170_s12 = smov 128   ;;  %s171_s13 = smov 8  }
   0xd   :  { %27 = dma.hbm_to_vmem [thread:$0]  %s198_s0, 256, %s22_s10, [#allocation3], %s170_s12, %s170_s12, %s171_s13  }
   0xe   :  { %s172_s16 = smov [#allocation5]  }
   0xf   :  { %s39_s17 = sshll.u32 %s172_s16, 4  ;;  %s40_s17 = int_to_ptr.vmem [resolvable:$true] %s39_s17 }
  0x10   :  { %s131_s18 = scalar_lea.vmem %s40_s17, 256  ;;  %p136_p6 = scmp.lt.s32.totalorder %s40_s17, %s40_s17 }
  0x11   :  { %p132_p5 = scmp.ne.s32.totalorder %s40_s17, %s131_s18  ;;  %p137_p7 = scmp.lt.s32.totalorder %s131_s18, %s131_s18 }
  0x13   :  { %p138_p8 = por %p137_p7, %p136_p6 }
  0x15   :  { %p139_p9 = pnand %p138_p8, %p132_p5 }
  0x17   :  { %142 = shalt.err (!%p139_p9)
}
  0x18   :  { %45 = dma.hbm_to_vmem [thread:$0]  %s199_s1, 256, %s40_s17, [#allocation6], %s170_s12, %s170_s12, %s171_s13  }
  0x19   :  { %163 = dma.done.wait [#allocation3], 256  }
  0x1a   :  { %164 = vsyncadd [#allocation3], 4294967040 }
  0x1b   :  { %165 = dma.done.wait [#allocation6], 256  }
  0x1c   :  { %166 = vsyncadd [#allocation6], 4294967040  ;;  %v65_v0 = vld [vmem:[#allocation5] sm:$0xff]  ;;  %v66_v1 = vld [vmem:[#allocation5 + $0x8] sm:$0xff]  ;;  %s173_s0 = smov [#allocation7]  }
  0x1d   :  { %v67_v2 = vld [vmem:[#allocation2] sm:$0xff]  ;;  %v68_v3 = vld [vmem:[#allocation2 + $0x8] sm:$0xff]  ;;  %s83_s21 = sshll.u32 %s173_s0, 4  ;;  %s84_s21 = int_to_ptr.vmem [resolvable:$true] %s83_s21 }
  0x1e   :  { %v69_v4 = vsub.f32 %v65_v0, %v67_v2  ;;  %v70_v5 = vsub.f32 %v66_v1, %v68_v3  ;;  %s143_s22 = scalar_lea.vmem %s84_s21, 128  ;;  %p148_p11 = scmp.lt.s32.totalorder %s84_s21, %s84_s21 }
  0x1f   :  { %p144_p10 = scmp.ne.s32.totalorder %s84_s21, %s143_s22  ;;  %p149_p12 = scmp.lt.s32.totalorder %s143_s22, %s143_s22 }
  0x20   :  { %v71_v6 = vand.u32 2147483647, %v69_v4  ;;  %v72_v7 = vand.u32 2147483647, %v70_v5 }
  0x21   :  { %p150_p13 = por %p149_p12, %p148_p11 }
  0x22   :  { %v73_v8 = vadd.f32 %v72_v7, %v71_v6 }
  0x23   :  { %p151_p0 = pnand %p150_p13, %p144_p10 }
  0x24   :  { %76 = vst [vmem:[#allocation7] sm:$0xff] %v73_v8 }
  0x25   :  { %154 = shalt.err (!%p151_p0)
}
  0x26   :  { %86 = dma.vmem_to_hbm [thread:$0]  %s84_s21, 128, %s200_s2, [#allocation4]  }
  0x27   :  { %167 = dma.done.wait [#allocation4], 128  }
  0x28   :  { %168 = vsyncadd [#allocation4], 4294967168 }
  0x29   :  { %90 = vsyncpa [#allocation3], 1 }
  0x2a   :  { %91 = vsyncpa [#allocation6], 1 }
  0x2b   :  { %92 = vsyncpa [#allocation4], 1 }

</bundles_post_ra>
